<compile_context>
chip_gen: v7x
topology: tpu7x:2x2x1
jax: 0.10.0
libtpu: 0.0.40
codegen_flags: <defaults>
</compile_context>

<pallas_src>
import functools
import math

import jax
import jax.numpy as jnp
from jax.experimental import pallas as pl
from jax.experimental.pallas import tpu as pltpu


def _gating_kernel(x_ref, w_ref, b_ref, out_ref, *, approx_recip):
    B, TS, HP = x_ref.shape

    x = x_ref[...]                                    # (B, TS, HP), compute dtype
    cd = x.dtype

    # ---- fused QKV projection: one MXU matmul, f32 accumulate + f32 bias ----
    x2d = x.reshape(B * TS, HP)                       # merge leading dims (TS % 8 == 0 or TS == S)
    qkv = jnp.dot(x2d, w_ref[...], preferred_element_type=jnp.float32)
    qkv = qkv + b_ref[...]                            # (B*TS, 3HP) f32
    qkv = qkv.reshape(B, TS, 3 * HP)

    # s-major layout so the attention contractions are batched (over s) matmuls.
    qkv_s = pltpu.einshape("bsn->sbn", qkv)           # (TS, B, 3HP) f32
    qs = qkv_s[:, :, 0 * HP:1 * HP]                   # already scaled by 1/sqrt(H)
    ks = qkv_s[:, :, 1 * HP:2 * HP]                   # slices at 128-lane multiples -> views
    vs = qkv_s[:, :, 2 * HP:3 * HP]

    # scores[s, i, j] = sum_h Q[i, s, h] * K[j, s, h] / sqrt(H)        (MXU)
    scores = jnp.einsum("sbh,sch->sbc", qs.astype(cd), ks.astype(cd),
                        preferred_element_type=jnp.float32)           # (TS, B, B)

    # torch nn.Softmax(dim=1) on (S, B, B): normalize over i (axis 1), in f32.
    m = jnp.max(scores, axis=1, keepdims=True)
    e = jnp.exp(scores - m)
    denom = jnp.sum(e, axis=1, keepdims=True)
    attn = e * pl.reciprocal(denom, approx=approx_recip)              # (TS, B, B)

    # context[s, i, h] = sum_j attn[s, i, j] * V[j, s, h]              (MXU)
    ctx = jnp.einsum("sbc,sch->sbh", attn.astype(cd), vs.astype(cd),
                     preferred_element_type=jnp.float32)              # (TS, B, HP)

    # output = x.mean(dim=0) + context.transpose(0, 1).mean(dim=0)     (f32)
    out_ref[...] = (jnp.mean(x.astype(jnp.float32), axis=0)
                    + jnp.mean(ctx, axis=1))


def gating_layer1(x, wq, bq, wk, bk, wv, bv, *,
                  compute_dtype=jnp.bfloat16, ts=None):
    """GatingLayer1 forward.

    x: (B, S, H); wq/wk/wv: (H, H) torch-style (out, in); biases: (H,).
    Returns (S, H) float32 = x.mean(0) + context.mean(0).
    """
    B, S, H = x.shape
    use_bf16 = jnp.dtype(compute_dtype) == jnp.dtype(jnp.bfloat16)
    scale = 1.0 / math.sqrt(H)                        # scale uses the ORIGINAL hidden size

    # Pad the hidden (lane) dim to a multiple of 128: lane-dense loads/stores
    # and aligned MXU tiles.  Padded columns are zero, so Q/K padding does not
    # contribute to the scores, V padding gives zero context columns, and the
    # x-mean padding columns are zero too -> semantics unchanged after slicing.
    HP = max(128, ((H + 127) // 128) * 128)
    pad = HP - H

    def _pad_w(w):                                    # (out,in) -> padded (in, out) f32
        return jnp.pad(w.T.astype(jnp.float32), ((0, pad), (0, pad)))

    def _pad_b(b):
        return jnp.pad(b.astype(jnp.float32), (0, pad))

    # Fused (HP, 3HP) weight; score scale folded into the Q columns/bias.
    w_qkv = jnp.concatenate(
        [_pad_w(wq) * scale, _pad_w(wk), _pad_w(wv)], axis=1).astype(compute_dtype)
    b_qkv = jnp.concatenate(
        [_pad_b(bq) * scale, _pad_b(bk), _pad_b(bv)]).reshape(1, 3 * HP)   # bias stays f32
    x_in = jnp.pad(x, ((0, 0), (0, 0), (0, pad))).astype(compute_dtype)

    # Pick an S tile: largest power-of-two divisor (>= sublane minimum for the
    # compute dtype), else a single full-S tile.
    if ts is None:
        min_ts = 16 if use_bf16 else 8
        ts = S
        for cand in (512, 256, 128, 64, 32, 16, 8):
            if cand >= min_ts and S % cand == 0:
                ts = cand
                break
    grid = (S // ts,)

    kernel = functools.partial(_gating_kernel, approx_recip=use_bf16)

    out_p = pl.pallas_call(
        kernel,
        out_shape=jax.ShapeDtypeStruct((S, HP), jnp.float32),
        grid=grid,
        in_specs=[
            pl.BlockSpec((B, ts, HP), lambda s: (0, s, 0)),    # x tile over S
            pl.BlockSpec((HP, 3 * HP), lambda s: (0, 0)),      # fused W (grid-invariant)
            pl.BlockSpec((1, 3 * HP), lambda s: (0, 0)),       # fused bias (f32)
        ],
        out_specs=pl.BlockSpec((ts, HP), lambda s: (s, 0)),    # lane-dense (HP % 128 == 0)
        compiler_params=pltpu.CompilerParams(
            dimension_semantics=("parallel",)),
    )(x_in, w_qkv, b_qkv)

    return out_p[:, :H] if pad else out_p


def _reference(x, wq, bq, wk, bk, wv, bv):
    H = x.shape[-1]
    Q = x @ wq.T + bq
    K = x @ wk.T + bk
    V = x @ wv.T + bv
    Qs = jnp.swapaxes(Q, 0, 1)                  # (S, B, H)
    Ks = jnp.swapaxes(K, 0, 1)
    Vs = jnp.swapaxes(V, 0, 1)
    scores = jnp.matmul(Qs, jnp.swapaxes(Ks, -1, -2)) / math.sqrt(H)   # (S, B, B)
    attn = jax.nn.softmax(scores, axis=1)       # dim=1, as in the torch module
    ctx = jnp.matmul(attn, Vs)                  # (S, B, H)
    ctx = jnp.swapaxes(ctx, 0, 1)               # (B, S, H)
    return x.mean(axis=0) + ctx.mean(axis=0)


if __name__ == "__main__":
    B, S, H = 2, 8, 32
    key = jax.random.PRNGKey(0)
    kx, kq, kbq, kk, kbk, kv, kbv = jax.random.split(key, 7)

    x = jax.random.normal(kx, (B, S, H), jnp.float32)
    bound = 1.0 / math.sqrt(H)                   # torch nn.Linear default init range
    wq = jax.random.uniform(kq, (H, H), jnp.float32, -bound, bound)
    bq = jax.random.uniform(kbq, (H,), jnp.float32, -bound, bound)
    wk = jax.random.uniform(kk, (H, H), jnp.float32, -bound, bound)
    bk = jax.random.uniform(kbk, (H,), jnp.float32, -bound, bound)
    wv = jax.random.uniform(kv, (H, H), jnp.float32, -bound, bound)
    bv = jax.random.uniform(kbv, (H,), jnp.float32, -bound, bound)

    ref = _reference(x, wq, bq, wk, bk, wv, bv)

    # f32 MXU-operand path: close agreement with the pure-f32 reference.
    out_f32 = jax.block_until_ready(
        gating_layer1(x, wq, bq, wk, bk, wv, bv, compute_dtype=jnp.float32))
    assert out_f32.shape == (S, H), out_f32.shape
    err_f32 = float(jnp.max(jnp.abs(out_f32 - ref)))
    assert err_f32 < 3e-2, err_f32

    # Default bf16-MXU / f32-accumulate path.
    out_bf16 = jax.block_until_ready(gating_layer1(x, wq, bq, wk, bk, wv, bv))
    assert out_bf16.shape == (S, H), out_bf16.shape
    err_bf16 = float(jnp.max(jnp.abs(out_bf16 - ref)))
    assert err_bf16 < 8e-2, err_bf16

    print("KERNEL_OK")
</pallas_src>

<mosaic_0001>
module attributes {stable_mosaic.version = 11 : i64} {
  func.func @_gating_kernel(%arg0: i32, %arg1: memref<2x8x128xf32, #tpu.memory_space<vmem>>, %arg2: memref<128x384xf32, #tpu.memory_space<vmem>>, %arg3: memref<1x384xf32, #tpu.memory_space<vmem>>, %arg4: memref<8x128xf32, #tpu.memory_space<vmem>>) attributes {dimension_semantics = [#tpu.dimension_semantics<parallel>], iteration_bounds = array<i64: 1>, scalar_prefetch = 0 : i64, scratch_operands = 0 : i64, tpu.core_type = #tpu.core_type<tc>, window_params = [{transform_indices = @transform_0, window_bounds = array<i64: 2, 8, 128>}, {pipeline_mode = #tpu.pipeline_mode<synchronous>, transform_indices = @transform_1, window_bounds = array<i64: 128, 384>}, {pipeline_mode = #tpu.pipeline_mode<synchronous>, transform_indices = @transform_2, window_bounds = array<i64: 1, 384>}, {transform_indices = @transform_3, window_bounds = array<i64: 8, 128>}]} {
    %c0 = arith.constant 0 : index
    %c0_0 = arith.constant 0 : index
    %c0_1 = arith.constant 0 : index
    %0 = vector.load %arg1[%c0, %c0_0, %c0_1] : memref<2x8x128xf32, #tpu.memory_space<vmem>>, vector<2x8x128xf32>
    %1 = vector.shape_cast %0 : vector<2x8x128xf32> to vector<16x128xf32>
    %c0_2 = arith.constant 0 : index
    %c0_3 = arith.constant 0 : index
    %2 = vector.load %arg2[%c0_2, %c0_3] : memref<128x384xf32, #tpu.memory_space<vmem>>, vector<128x384xf32>
    %cst = arith.constant dense<0.000000e+00> : vector<16x384xf32>
    %3 = tpu.matmul %1, %2, %cst {dimension_numbers = #tpu.dot_dimension_numbers<[1], [0], [0], [1], [0, 0, 1, 1], [], []>} : vector<16x128xf32>, vector<128x384xf32>, vector<16x384xf32> -> vector<16x384xf32>
    %c0_4 = arith.constant 0 : index
    %c0_5 = arith.constant 0 : index
    %4 = vector.load %arg3[%c0_4, %c0_5] : memref<1x384xf32, #tpu.memory_space<vmem>>, vector<1x384xf32>
    %5 = vector.broadcast %4 : vector<1x384xf32> to vector<16x384xf32>
    %6 = arith.addf %3, %5 : vector<16x384xf32>
    %7 = vector.shape_cast %6 : vector<16x384xf32> to vector<2x8x384xf32>
    %8 = tpu.transpose %7, [1, 0, 2] : vector<2x8x384xf32> -> vector<8x2x384xf32>
    %9 = vector.extract_strided_slice %8 {offsets = [0, 0, 0], sizes = [8, 2, 128], strides = [1, 1, 1]} : vector<8x2x384xf32> to vector<8x2x128xf32>
    %10 = vector.extract_strided_slice %8 {offsets = [0, 0, 128], sizes = [8, 2, 128], strides = [1, 1, 1]} : vector<8x2x384xf32> to vector<8x2x128xf32>
    %11 = vector.extract_strided_slice %8 {offsets = [0, 0, 256], sizes = [8, 2, 128], strides = [1, 1, 1]} : vector<8x2x384xf32> to vector<8x2x128xf32>
    "tpu.trace_start"() <{level = 10 : i32, message = "sbh,sch->sbc"}> : () -> ()
    %cst_6 = arith.constant dense<0.000000e+00> : vector<8x2x2xf32>
    %12 = tpu.matmul %9, %10, %cst_6 {dimension_numbers = #tpu.dot_dimension_numbers<[2], [2], [1], [1], [0, 0, 0, 1, 1, 1], [0], [0]>} : vector<8x2x128xf32>, vector<8x2x128xf32>, vector<8x2x2xf32> -> vector<8x2x2xf32>
    "tpu.trace_stop"() : () -> ()
    %cst_7 = arith.constant dense<0xFF800000> : vector<8x2xf32>
    %13 = vector.multi_reduction <maximumf>, %12, %cst_7 [1] : vector<8x2x2xf32> to vector<8x2xf32>
    %14 = vector.shape_cast %13 : vector<8x2xf32> to vector<8x1x2xf32>
    %15 = vector.broadcast %14 : vector<8x1x2xf32> to vector<8x2x2xf32>
    %16 = arith.subf %12, %15 : vector<8x2x2xf32>
    %17 = math.exp %16 : vector<8x2x2xf32>
    %cst_8 = arith.constant dense<0.000000e+00> : vector<8x2xf32>
    %18 = vector.multi_reduction <add>, %17, %cst_8 [1] : vector<8x2x2xf32> to vector<8x2xf32>
    %19 = vector.shape_cast %18 : vector<8x2xf32> to vector<8x1x2xf32>
    %20 = tpu.reciprocal %19 : vector<8x1x2xf32> -> vector<8x1x2xf32>
    %21 = vector.broadcast %20 : vector<8x1x2xf32> to vector<8x2x2xf32>
    %22 = arith.mulf %17, %21 : vector<8x2x2xf32>
    "tpu.trace_start"() <{level = 10 : i32, message = "sbc,sch->sbh"}> : () -> ()
    %cst_9 = arith.constant dense<0.000000e+00> : vector<8x2x128xf32>
    %23 = tpu.matmul %22, %11, %cst_9 {dimension_numbers = #tpu.dot_dimension_numbers<[2], [1], [1], [2], [0, 0, 0, 1, 1, 2], [0], [0]>} : vector<8x2x2xf32>, vector<8x2x128xf32>, vector<8x2x128xf32> -> vector<8x2x128xf32>
    "tpu.trace_stop"() : () -> ()
    %cst_10 = arith.constant dense<0.000000e+00> : vector<8x128xf32>
    %24 = vector.multi_reduction <add>, %0, %cst_10 [0] : vector<2x8x128xf32> to vector<8x128xf32>
    %cst_11 = arith.constant 2.000000e+00 : f32
    %25 = vector.broadcast %cst_11 : f32 to vector<8x128xf32>
    %26 = arith.divf %24, %25 : vector<8x128xf32>
    %cst_12 = arith.constant dense<0.000000e+00> : vector<8x128xf32>
    %27 = vector.multi_reduction <add>, %23, %cst_12 [1] : vector<8x2x128xf32> to vector<8x128xf32>
    %cst_13 = arith.constant 2.000000e+00 : f32
    %28 = vector.broadcast %cst_13 : f32 to vector<8x128xf32>
    %29 = arith.divf %27, %28 : vector<8x128xf32>
    %30 = arith.addf %26, %29 : vector<8x128xf32>
    %c0_14 = arith.constant 0 : index
    %c0_15 = arith.constant 0 : index
    %31 = vector.load %arg4[%c0_14, %c0_15] : memref<8x128xf32, #tpu.memory_space<vmem>>, vector<8x128xf32>
    tpu.vector_store %arg4[%c0_14, %c0_15], %30 {strides = array<i32>} : memref<8x128xf32, #tpu.memory_space<vmem>>, vector<8x128xf32>,
    return
  }
  func.func @transform_0(%arg0: i32) -> (i32, i32, i32) {
    %c0_i32 = arith.constant 0 : i32
    %c0_i32_0 = arith.constant 0 : i32
    %c0_i32_1 = arith.constant 0 : i32
    return %c0_i32, %arg0, %c0_i32_0 : i32, i32, i32
  }
  func.func @transform_1(%arg0: i32) -> (i32, i32) {
    %c0_i32 = arith.constant 0 : i32
    %c0_i32_0 = arith.constant 0 : i32
    %c0_i32_1 = arith.constant 0 : i32
    return %c0_i32, %c0_i32_0 : i32, i32
  }
  func.func @transform_2(%arg0: i32) -> (i32, i32) {
    %c0_i32 = arith.constant 0 : i32
    %c0_i32_0 = arith.constant 0 : i32
    %c0_i32_1 = arith.constant 0 : i32
    return %c0_i32, %c0_i32_0 : i32, i32
  }
  func.func @transform_3(%arg0: i32) -> (i32, i32) {
    %c0_i32 = arith.constant 0 : i32
    %c0_i32_0 = arith.constant 0 : i32
    return %arg0, %c0_i32 : i32, i32
  }
}

</mosaic_0001>

<bundles_post_ra>
// kernel: tpu_custom_call.1
= control target key start
LH: loop header
LB: loop body
LE: loop exit
PB: predicated region body
PF: predicated region fallthrough
CT: control target
= control target key end

     0   :  { %8 = vsyncpa [#allocation3], 0  ;;  %s2536_s0 = inlined_call_operand.hbm [shape: f32[2,8,128], index: 0, kind: input, shape index: {}]   ;;  %s2537_s1 = inlined_call_operand.hbm [shape: f32[128,384], index: 1, kind: input, shape index: {}]   ;;  %s2538_s2 = inlined_call_operand.vmem [shape: f32[1,384], index: 2, kind: input, shape index: {}]   ;;  %s2539_s3 = inlined_call_operand.hbm [shape: f32[8,128], index: 3, kind: output, shape index: {}]  }
   0x1   :  { %9 = vsyncpa [#allocation6], 0 }
   0x2   :  { %10 = vsyncpa [#allocation4], 0  ;;  %s2251_s12 = smov [#allocation2]   ;;  %s2179_s16 = scalar_lea.hbm %s2536_s0, 256 }
   0x3   :  { %s16_s13 = sshll.u32 %s2251_s12, 4  ;;  %p2180_p0 = scmp.ne.s32.totalorder %s2536_s0, %s2179_s16  ;;  %s17_s13 = int_to_ptr.vmem [resolvable:$true] %s16_s13 }
   0x4   :  { %p2183_p1 = scmp.lt.u32.totalorder %s2179_s16, %s2536_s0 }
   0x6   :  { %p2185_p2 = pnand %p2183_p1, %p2180_p0 }
   0x8   :  { %2188 = shalt.err (!%p2185_p2)
}
   0x9   :  { %s2189_s21 = scalar_lea.vmem %s17_s13, 256  ;;  %p2194_p4 = scmp.lt.s32.totalorder %s17_s13, %s17_s13 }
   0xa   :  { %p2190_p3 = scmp.ne.s32.totalorder %s17_s13, %s2189_s21  ;;  %p2195_p5 = scmp.lt.s32.totalorder %s2189_s21, %s2189_s21 }
   0xc   :  { %p2196_p6 = por %p2195_p5, %p2194_p4 }
   0xe   :  { %p2197_p7 = pnand %p2196_p6, %p2190_p3 }
  0x10   :  { %2200 = shalt.err (!%p2197_p7)
}
  0x11   :  { %s2252_s22 = smov 128   ;;  %s2253_s23 = smov 8  }
  0x12   :  { %22 = dma.hbm_to_vmem [thread:$0]  %s2536_s0, 256, %s17_s13, [#allocation3], %s2252_s22, %s2252_s22, %s2253_s23  }
  0x13   :  { %s2254_s26 = smov [#allocation5]   ;;  %s2201_s30 = scalar_lea.hbm %s2537_s1, 6144 }
  0x14   :  { %s28_s27 = sshll.u32 %s2254_s26, 4  ;;  %p2202_p8 = scmp.ne.s32.totalorder %s2537_s1, %s2201_s30  ;;  %s29_s27 = int_to_ptr.vmem [resolvable:$true] %s28_s27 }
  0x15   :  { %p2205_p9 = scmp.lt.u32.totalorder %s2201_s30, %s2537_s1 }
  0x17   :  { %p2207_p10 = pnand %p2205_p9, %p2202_p8 }
  0x19   :  { %2210 = shalt.err (!%p2207_p10)
}
  0x1a   :  { %s2211_s8 = scalar_lea.vmem %s29_s27, 6144  ;;  %p2216_p12 = scmp.lt.s32.totalorder %s29_s27, %s29_s27 }
  0x1b   :  { %p2212_p11 = scmp.ne.s32.totalorder %s29_s27, %s2211_s8  ;;  %p2217_p13 = scmp.lt.s32.totalorder %s2211_s8, %s2211_s8 }
  0x1d   :  { %p2218_p0 = por %p2217_p13, %p2216_p12 }
  0x1f   :  { %p2219_p1 = pnand %p2218_p0, %p2212_p11 }
  0x21   :  { %2222 = shalt.err (!%p2219_p1)
}
  0x22   :  { %s2255_s0 = smov 384   ;;  %s2256_s9 = smov 24  }
  0x23   :  { %34 = dma.hbm_to_vmem [thread:$0]  %s2537_s1, 6144, %s29_s27, [#allocation6], %s2255_s0, %s2255_s0, %s2256_s9  }
  0x24   :  { %2245 = dma.done.wait [#allocation3], 256  }
  0x25   :  { %2246 = vsyncadd [#allocation3], 4294967040 }
  0x26   :  { %2247 = dma.done.wait [#allocation6], 6144  }
  0x27   :  { %2248 = vsyncadd [#allocation6], 4294961152  ;;  %v2257_v0 = vmov 0.0   ;;  %v46_v1 = vld [vmem:[#allocation5 + $0x8] sm:$0xff]  ;;  %v49_v2 = vld [vmem:[#allocation5 + $0x20] sm:$0xff]  ;;  %vm2258_vm0 = vmmov 0  }
  0x28   :  { %174 = vmatprep.mubr.f32.mxu0 %v2257_v0  ;;  %v45_v3 = vld [vmem:[#allocation5] sm:$0xff]  ;;  %v2072_v4 = vpack.c.bf16 %v49_v2, %v46_v1  ;;  %v48_v5 = vld [vmem:[#allocation5 + $0x18] sm:$0xff]  ;;  %v55_v7 = vld [vmem:[#allocation5 + $0x50] sm:$0xff]  ;;  %vm1177_vm1 = vcmask 1041408   ;;  %vm1020_vm2 = vcmask 9216   ;;  %vm1173_vm3 = vcmask 15360  }
  0x29   :  { %v52_v6 = vld [vmem:[#allocation5 + $0x38] sm:$0xff]  ;;  %v2074_v8 = vpack.c.bf16 %v48_v5, %v45_v3  ;;  %v51_v10 = vld [vmem:[#allocation5 + $0x30] sm:$0xff]  ;;  %v54_v11 = vld [vmem:[#allocation5 + $0x48] sm:$0xff]  ;;  %vm1858_vm4 = vcmask 1041409   ;;  %vm1860_vm5 = vcmask 1042434   ;;  %vm1862_vm6 = vcmask 1043459  }
  0x2a   :  { %v2076_v9 = vpack.c.bf16 %v55_v7, %v52_v6  ;;  %v58_v12 = vld [vmem:[#allocation5 + $0x68] sm:$0xff]  ;;  %2073 = vmatprep.subr.bf16.mxu0 %v2072_v4  ;;  %v61_v13 = vld [vmem:[#allocation5 + $0x80] sm:$0xff]  ;;  %v2078_v14 = vpack.c.bf16 %v54_v11, %v51_v10  ;;  %v60_v17 = vld [vmem:[#allocation5 + $0x78] sm:$0xff]  ;;  %vm1864_vm7 = vcmask 1044484   ;;  %vm1866_vm8 = vcmask 1045509  }
  0x2b   :  { %2075 = vmatpush1.bf16.msra.mxu0 %v2074_v8  ;;  %v2080_v15 = vpack.c.bf16 %v61_v13, %v58_v12  ;;  %v57_v16 = vld [vmem:[#allocation5 + $0x60] sm:$0xff]  ;;  %v64_v18 = vld [vmem:[#allocation5 + $0x98] sm:$0xff]  ;;  %v67_v19 = vld [vmem:[#allocation5 + $0xb0] sm:$0xff]  ;;  %v95_v12 = vlaneseq  ;;  %vm1868_vm9 = vcmask 1046534   ;;  %vm1870_vm10 = vcmask 1047559  }
  0x2c   :  { %2077 = vmatprep.subr.bf16.mxu0 %v2076_v9  ;;  %v2082_v20 = vpack.c.bf16 %v60_v17, %v57_v16  ;;  %v2084_v21 = vpack.c.bf16 %v67_v19, %v64_v18  ;;  %v63_v22 = vld [vmem:[#allocation5 + $0x90] sm:$0xff]  ;;  %v66_v23 = vld [vmem:[#allocation5 + $0xa8] sm:$0xff]  ;;  %v73_v25 = vld [vmem:[#allocation5 + $0xe0] sm:$0xff]  ;;  %v2259_v17 = vmov 1983009808  }
  0x2d   :  { %v70_v24 = vld [vmem:[#allocation5 + $0xc8] sm:$0xff]  ;;  %v2307_v26 = vld [vmem:[#allocation2] sm:$0xff]  ;;  %v2086_v29 = vpack.c.bf16 %v66_v23, %v63_v22  ;;  %v69_v30 = vld [vmem:[#allocation5 + $0xc0] sm:$0xff]  ;;  %v2322_v13 = vshrl.u32 %v95_v12, 7  ;;  %v264_v18 = vunpack.c.l.s4 %v2259_v17  ;;  %v2260_v23 = vmov 1934713408  }
  0x2e   :  { %v47_v27 = vld [vmem:[#allocation5 + $0x10] sm:$0xff]  ;;  %v50_v28 = vld [vmem:[#allocation5 + $0x28] sm:$0xff]  ;;  %1989 = vmatprep.mubr.f32.mxu1 %v2307_v26  ;;  %v53_v32 = vld [vmem:[#allocation5 + $0x40] sm:$0xff]  ;;  %v2088_v34 = vpack.c.bf16 %v73_v25, %v70_v24  ;;  %v295_v24 = vunpack.c.l.s4 %v2260_v23 }
  0x2f   :  { %2079 = vmatpush1.bf16.msra.mxu0 %v2078_v14  ;;  %v2104_v31 = vpack.c.bf16 %v50_v28, %v47_v27  ;;  %v56_v33 = vld [vmem:[#allocation5 + $0x58] sm:$0xff]  ;;  %v59_v37 = vld [vmem:[#allocation5 + $0x70] sm:$0xff]  ;;  %v62_v38 = vld [vmem:[#allocation5 + $0x88] sm:$0xff]  ;;  %v97_v14 = vsub.s32 0, %v2322_v13  ;;  %v101_v16 = vsub.s32 1, %v2322_v13 }
  0x30   :  { %2081 = vmatprep.subr.bf16.mxu0 %v2080_v15  ;;  %v72_v35 = vld [vmem:[#allocation5 + $0xd8] sm:$0xff]  ;;  %v2108_v36 = vpack.c.bf16 %v56_v33, %v53_v32  ;;  %v79_v40 = vld [vmem:[#allocation5 + $0x110] sm:$0xff]  ;;  %v2112_v43 = vpack.c.bf16 %v62_v38, %v59_v37  ;;  %v78_v45 = vld [vmem:[#allocation5 + $0x108] sm:$0xff] }
  0x31   :  { %v76_v39 = vld [vmem:[#allocation5 + $0xf8] sm:$0xff]  ;;  %2105 = vmatprep.subr.bf16.mxu1 %v2104_v31  ;;  %v2090_v41 = vpack.c.bf16 %v72_v35, %v69_v30  ;;  %v75_v42 = vld [vmem:[#allocation5 + $0xf0] sm:$0xff]  ;;  %v65_v46 = vld [vmem:[#allocation5 + $0xa0] sm:$0xff]  ;;  %v296_v30 = vunpack.c.0.s8 %v295_v24 }
  0x32   :  { %2107 = vmatpush3.bf16.msra.mxu1 %v2104_v31  ;;  %v2092_v44 = vpack.c.bf16 %v79_v40, %v76_v39  ;;  %v68_v47 = vld [vmem:[#allocation5 + $0xb8] sm:$0xff]  ;;  %v82_v48 = vld [vmem:[#allocation5 + $0x128] sm:$0xff]  ;;  %v85_v49 = vld [vmem:[#allocation5 + $0x140] sm:$0xff]  ;;  %v2094_v50 = vpack.c.bf16 %v78_v45, %v75_v42 }
  0x33   :  { %2083 = vmatpush1.bf16.msra.mxu0 %v2082_v20  ;;  %2109 = vmatprep.subr.bf16.mxu1 %v2108_v36  ;;  %v81_v51 = vld [vmem:[#allocation5 + $0x120] sm:$0xff]  ;;  %v2116_v52 = vpack.c.bf16 %v68_v47, %v65_v46  ;;  %v2096_v53 = vpack.c.bf16 %v85_v49, %v82_v48  ;;  %v84_v54 = vld [vmem:[#allocation5 + $0x138] sm:$0xff]  ;;  %v71_v55 = vld [vmem:[#allocation5 + $0xd0] sm:$0xff]  ;;  %v2342_v40 = vsub.s32 %v296_v30, %v2322_v13 }
  0x34   :  { %2085 = vmatprep.subr.bf16.mxu0 %v2084_v21  ;;  %v74_v56 = vld [vmem:[#allocation5 + $0xe8] sm:$0xff]  ;;  %v88_v57 = vld [vmem:[#allocation5 + $0x158] sm:$0xff]  ;;  %v91_v58 = vld [vmem:[#allocation5 + $0x170] sm:$0xff]  ;;  %v2098_v59 = vpack.c.bf16 %v84_v54, %v81_v51  ;;  %v265_v21 = vunpack.c.0.s8 %v264_v18 }
  0x35   :  { %v87_v60 = vld [vmem:[#allocation5 + $0x150] sm:$0xff]  ;;  %v2120_v61 = vpack.c.bf16 %v74_v56, %v71_v55  ;;  %v2100_v62 = vpack.c.bf16 %v91_v58, %v88_v57  ;;  %v90_v63 = vld [vmem:[#allocation5 + $0x168] sm:$0xff]  ;;  %v77_v1 = vld [vmem:[#allocation5 + $0x100] sm:$0xff] }
  0x36   :  { %2111 = vmatpush3.bf16.msra.mxu1 %v2108_v36  ;;  %v80_v2 = vld [vmem:[#allocation5 + $0x118] sm:$0xff]  ;;  %v2102_v3 = vpack.c.bf16 %v90_v63, %v87_v60  ;;  %v83_v6 = vld [vmem:[#allocation5 + $0x130] sm:$0xff]  ;;  %v86_v7 = vld [vmem:[#allocation5 + $0x148] sm:$0xff] }
  0x37   :  { %2087 = vmatpush1.bf16.msra.mxu0 %v2086_v29  ;;  %2113 = vmatprep.subr.bf16.mxu1 %v2112_v43  ;;  %v2124_v4 = vpack.c.bf16 %v80_v2, %v77_v1  ;;  %v2313_v5 = vld [vmem:[#allocation2 + $0x8] sm:$0xff]  ;;  %v2128_v8 = vpack.c.bf16 %v86_v7, %v83_v6  ;;  %v89_v9 = vld [vmem:[#allocation5 + $0x160] sm:$0xff]  ;;  %v2328_v15 = vld [vmem:[%s2538_s2] sm:$0x7]  ;;  %v2334_v29 = vsub.s32 %v265_v21, %v2322_v13  ;;  %s2261_s2 = smov [#allocation7]  }
  0x38   :  { %2089 = vmatprep.subr.bf16.mxu0 %v2088_v34  ;;  %v92_v10 = vld [vmem:[#allocation5 + $0x178] sm:$0xff]  ;;  %v98_v19 = vrot.slane %v2328_v15, %v97_v14  ;;  %v102_v20 = vrot.slane %v2328_v15, %v101_v16  ;;  %s1881_s13 = sshll.u32 %s2261_s2, 4  ;;  %s1882_s13 = int_to_ptr.vmem [resolvable:$true] %s1881_s13 }
  0x39   :  { %v2132_v11 = vpack.c.bf16 %v92_v10, %v89_v9  ;;  %v105_v10 = vsub.s32 2, %v2322_v13  ;;  %s2223_s14 = scalar_lea.vmem %s1882_s13, 128  ;;  %p2228_p3 = scmp.lt.s32.totalorder %s1882_s13, %s1882_s13 }
  0x3a   :  { %2115 = vmatpush3.bf16.msra.mxu1 %v2112_v43  ;;  %p2224_p2 = scmp.ne.s32.totalorder %s1882_s13, %s2223_s14  ;;  %p2229_p4 = scmp.lt.s32.totalorder %s2223_s14, %s2223_s14 }
  0x3b   :  { %2091 = vmatpush1.bf16.msra.mxu0 %v2090_v41  ;;  %2117 = vmatprep.subr.bf16.mxu1 %v2116_v52 }
  0x3c   :  { %2093 = vmatprep.subr.bf16.mxu0 %v2092_v44  ;;  %p2230_p5 = por %p2229_p4, %p2228_p3 }
  0x3e   :  { %2119 = vmatpush3.bf16.msra.mxu1 %v2116_v52  ;;  %p2231_p6 = pnand %p2230_p5, %p2224_p2 }
  0x3f   :  { %2095 = vmatpush1.bf16.msra.mxu0 %v2094_v50  ;;  %2121 = vmatprep.subr.bf16.mxu1 %v2120_v61 }
  0x40   :  { %2097 = vmatprep.subr.bf16.mxu0 %v2096_v53 }
  0x42   :  { %2123 = vmatpush3.bf16.msra.mxu1 %v2120_v61 }
  0x43   :  { %2099 = vmatpush1.bf16.msra.mxu0 %v2098_v59  ;;  %2125 = vmatprep.subr.bf16.mxu1 %v2124_v4 }
  0x44   :  { %2101 = vmatprep.subr.bf16.mxu0 %v2100_v62 }
  0x46   :  { %2127 = vmatpush3.bf16.msra.mxu1 %v2124_v4 }
  0x47   :  { %2103 = vmatpush1.bf16.msra.mxu0 %v2102_v3  ;;  %2129 = vmatprep.subr.bf16.mxu1 %v2128_v8 }
  0x48   :  { %1997 = vmatprep.subr.mxu0 %v2257_v0 }
  0x4a   :  { %175 = vmatmul.mubr.f32.vlgmr.msra.gmra.mrb[0].mxu0 %v2307_v26  ;;  %2131 = vmatpush3.bf16.msra.mxu1 %v2128_v8 }
  0x4b   :  { %180 = vmatprep.mubr.f32.mxu0 %v2257_v0  ;;  %2133 = vmatprep.subr.bf16.mxu1 %v2132_v11 }
  0x4e   :  { %181 = vmatmul.mubr.f32.gmra.mrb[2].mxu0 %v2313_v5  ;;  %2135 = vmatpush3.bf16.msra.mxu1 %v2132_v11  ;;  %v106_v11 = vrot.slane %v2328_v15, %v105_v10 }
  0x4f   :  { %1992 = vmatprep.subr.mxu1 %v2257_v0  ;;  %1999 = vmatprep.mubr.msk.f32.mxu0 %vm2258_vm0, %v2257_v0 }
  0x51   :  { %1990 = vmatmul.mubr.f32.vlgmr.msra.gmra.mrb[0].mxu1 %v2313_v5 }
  0x52   :  { %1994 = vmatprep.mubr.msk.f32.mxu1 %vm2258_vm0, %v2257_v0 }
 0x11d   :  { %v176_v22 = vpop.f32.mrb[0].mxu0 }
 0x11e   :  { %v177_v25 = vadd.f32 %v176_v22, %v98_v19  ;;  %v178_v27 = vpop.f32.mrb[1].mxu0 }
 0x11f   :  { %v179_v28 = vadd.f32 %v178_v27, %v102_v20 }
 0x120   :  { %v262_v32 = vcombine.high %v177_v25, %v2257_v0  ;;  %v269_v37 = vrot.slane %v177_v25, %v2334_v29 }
 0x121   :  { %v182_v31 = vpop.f32.mrb[2].mxu0  ;;  %v328_v35 = vcombine.high %v179_v28, %v2257_v0  ;;  %v335_v41 = vrot.slane %v179_v28, %v2334_v29 }
 0x122   :  { %v183_v33 = vadd.f32 %v182_v31, %v98_v19  ;;  %v184_v34 = vpop.f32.mrb[3].mxu0  ;;  %v276_v44 = vrot.slane %v262_v32, %v2334_v29 }
 0x123   :  { %v185_v36 = vadd.f32 %v184_v34, %v102_v20  ;;  %v342_v48 = vrot.slane %v328_v35, %v2334_v29 }
 0x124   :  { %v277_v38 = vcombine.high %v183_v33, %v2257_v0  ;;  %v284_v39 = vrot.slane %v183_v33, %v2334_v29  ;;  %v1991_v12 = vpop.f32.mrb[0].mxu1 }
 0x125   :  { %v343_v42 = vcombine.high %v185_v36, %v2257_v0  ;;  %v350_v43 = vrot.slane %v185_v36, %v2334_v29  ;;  %v259_v14 = vadd.f32 %v1991_v12, %v106_v11  ;;  %v253_v16 = vpop.f32.mrb[1].mxu1 }
 0x126   :  { %v291_v45 = vrot.slane %v277_v38, %v2334_v29  ;;  %v292_v46 = vcombine.low %v269_v37, %v284_v39  ;;  %v293_v47 = vcombine.high %v269_v37, %v284_v39  ;;  %v254_v17 = vadd.f32 %v253_v16, %v106_v11 }
 0x127   :  { %v357_v49 = vrot.slane %v343_v42, %v2334_v29  ;;  %v358_v50 = vcombine.low %v335_v41, %v350_v43  ;;  %v359_v51 = vcombine.high %v335_v41, %v350_v43  ;;  %v409_v18 = vcombine.high %v259_v14, %v2257_v0 }
 0x128   :  { %v308_v52 = vcombine.low %v276_v44, %v291_v45  ;;  %v309_v53 = vcombine.high %v276_v44, %v291_v45  ;;  %v300_v57 = vrot.slane %v292_v46, %v2342_v40  ;;  %v307_v60 = vrot.slane %v293_v47, %v2342_v40 }
 0x129   :  { %v366_v54 = vrot.slane %v358_v50, %v2342_v40  ;;  %v374_v55 = vcombine.low %v342_v48, %v357_v49  ;;  %v375_v56 = vcombine.high %v342_v48, %v357_v49  ;;  %v373_v58 = vrot.slane %v359_v51, %v2342_v40 }
 0x12a   :  { %v324_v61 = vcombine.high %v300_v57, %v2257_v0  ;;  %v325_v1 = vcombine.high %v307_v60, %v2257_v0  ;;  %v316_v2 = vrot.slane %v308_v52, %v2342_v40  ;;  %v323_v7 = vrot.slane %v309_v53, %v2342_v40 }
 0x12b   :  { %1993 = vmatpush3.xpose.msra.mxu1 %v366_v54  ;;  %v390_v59 = vcombine.high %v366_v54, %v2257_v0  ;;  %v391_v62 = vcombine.high %v373_v58, %v2257_v0  ;;  %v382_v63 = vrot.slane %v374_v55, %v2342_v40  ;;  %v389_v4 = vrot.slane %v375_v56, %v2342_v40 }
 0x12c   :  { %2002 = vmatprep.subr.mxu1 %v2257_v0  ;;  %v326_v6 = vcombine.high %v316_v2, %v2257_v0  ;;  %v327_v9 = vcombine.high %v323_v7, %v2257_v0  ;;  %v2395_v19 = vrot.slane %v259_v14, %v2334_v29  ;;  %v394_v20 = vcombine.high %v254_v17, %v2257_v0 }
 0x12d   :  { %1998 = vmatpush3.xpose.msra.mxu0 %v390_v59  ;;  %v392_v3 = vcombine.high %v382_v63, %v2257_v0  ;;  %v393_v8 = vcombine.high %v389_v4, %v2257_v0  ;;  %v2399_v21 = vrot.slane %v254_v17, %v2334_v29  ;;  %v2402_v22 = vrot.slane %v409_v18, %v2334_v29 }
 0x12e   :  { %1995 = vmatmul.mubr.f32.vlgmr.msra.gmra.mrb[2].mxu1 %v300_v57  ;;  %2007 = vmatprep.subr.mxu0 %v2257_v0  ;;  %v2405_v13 = vrot.slane %v394_v20, %v2334_v29 }
 0x12f   :  { %2003 = vmatpush3.xpose.msra.mxu1 %v373_v58  ;;  %2004 = vmatprep.mubr.msk.f32.mxu1 %vm2258_vm0, %v2257_v0  ;;  %v424_v15 = vcombine.low %v2399_v21, %v2395_v19  ;;  %v425_v23 = vcombine.high %v2399_v21, %v2395_v19 }
 0x130   :  { %2000 = vmatmul.mubr.f32.vlgmr.msra.gmra.mrb[4].mxu0 %v324_v61  ;;  %2012 = vmatprep.subr.mxu1 %v2257_v0  ;;  %v440_v24 = vcombine.low %v2405_v13, %v2402_v22  ;;  %v441_v25 = vcombine.high %v2405_v13, %v2402_v22 }
 0x131   :  { %2008 = vmatpush3.xpose.msra.mxu0 %v391_v62  ;;  %2009 = vmatprep.mubr.msk.f32.mxu0 %vm2258_vm0, %v2257_v0  ;;  %v432_v27 = vrot.slane %v424_v15, %v2342_v40 }
 0x132   :  { %2005 = vmatmul.mubr.f32.vlgmr.msra.gmra.mrb[4].mxu1 %v307_v60  ;;  %2017 = vmatprep.subr.mxu0 %v2257_v0  ;;  %v448_v19 = vrot.slane %v440_v24, %v2342_v40 }
 0x133   :  { %2013 = vmatpush3.xpose.msra.mxu1 %v382_v63  ;;  %2014 = vmatprep.mubr.msk.f32.mxu1 %vm2258_vm0, %v2257_v0  ;;  %v456_v28 = vcombine.high %v432_v27, %v2257_v0 }
 0x134   :  { %2010 = vmatmul.mubr.f32.vlgmr.msra.gmra.mrb[6].mxu0 %v325_v1  ;;  %2022 = vmatprep.subr.mxu1 %v2257_v0 }
 0x135   :  { %2018 = vmatpush3.xpose.msra.mxu0 %v392_v3  ;;  %2019 = vmatprep.mubr.msk.f32.mxu0 %vm2258_vm0, %v2257_v0 }
 0x136   :  { %2015 = vmatmul.mubr.f32.vlgmr.msra.gmra.mrb[6].mxu1 %v316_v2  ;;  %2027 = vmatprep.subr.mxu0 %v2257_v0 }
 0x137   :  { %2023 = vmatpush3.xpose.msra.mxu1 %v389_v4  ;;  %2024 = vmatprep.mubr.msk.f32.mxu1 %vm2258_vm0, %v2257_v0 }
 0x138   :  { %2020 = vmatmul.mubr.f32.vlgmr.msra.gmra.mrb[8].mxu0 %v326_v6  ;;  %2032 = vmatprep.subr.mxu1 %v2257_v0 }
 0x139   :  { %2028 = vmatpush3.xpose.msra.mxu0 %v393_v8  ;;  %2029 = vmatprep.mubr.msk.f32.mxu0 %vm2258_vm0, %v2257_v0 }
 0x13a   :  { %2025 = vmatmul.mubr.f32.vlgmr.msra.gmra.mrb[8].mxu1 %v323_v7  ;;  %2037 = vmatprep.subr.mxu0 %v2257_v0 }
 0x13b   :  { %2034 = vmatprep.mubr.msk.f32.mxu1 %vm2258_vm0, %v2257_v0  ;;  %2033 = vmatpush3.msk.msra.mxu1 %vm1177_vm1, %v432_v27 }
 0x13c   :  { %2030 = vmatmul.mubr.f32.vlgmr.msra.gmra.mrb[10].mxu0 %v327_v9  ;;  %2042 = vmatprep.subr.mxu1 %v2257_v0 }
 0x13d   :  { %2039 = vmatprep.mubr.msk.f32.mxu0 %vm2258_vm0, %v2257_v0  ;;  %2038 = vmatpush3.msk.msra.mxu0 %vm1177_vm1, %v456_v28 }
 0x13e   :  { %2047 = vmatprep.subr.mxu0 %v2257_v0 }
 0x201   :  { %v526_v29 = vpop.f32.mrb[2].mxu1 }
 0x202   :  { %v1021_v30 = vsel %vm1020_vm2, %v526_v29, -inf  ;;  %v1996_v31 = vpop.f32.mrb[3].mxu1 }
 0x203   :  { %v1022_v32 = vrot.slane %v1021_v30, 4  ;;  %v596_v33 = vpop.f32.mrb[4].mxu0 }
 0x204   :  { %v1028_v34 = vsel %vm1020_vm2, %v596_v33, -inf  ;;  %v2001_v35 = vpop.f32.mrb[5].mxu0 }
 0x205   :  { %v1023_v36 = vmax.f32 %v1021_v30, %v1022_v32  ;;  %v1029_v37 = vrot.slane %v1028_v34, 4  ;;  %v666_v38 = vpop.f32.mrb[4].mxu1 }
 0x206   :  { %v1035_v39 = vsel %vm1020_vm2, %v666_v38, -inf  ;;  %v2006_v41 = vpop.f32.mrb[5].mxu1 }
 0x207   :  { %v1024_v42 = vrot.slane %v1023_v36, 2  ;;  %v1030_v43 = vmax.f32 %v1028_v34, %v1029_v37  ;;  %v1036_v44 = vrot.slane %v1035_v39, 4  ;;  %v736_v45 = vpop.f32.mrb[6].mxu0 }
 0x208   :  { %v1042_v46 = vsel %vm1020_vm2, %v736_v45, -inf  ;;  %v2011_v47 = vpop.f32.mrb[7].mxu0 }
 0x209   :  { %v1025_v48 = vmax.f32 %v1023_v36, %v1024_v42  ;;  %v1031_v49 = vrot.slane %v1030_v43, 2  ;;  %v1037_v50 = vmax.f32 %v1035_v39, %v1036_v44  ;;  %v1043_v51 = vrot.slane %v1042_v46, 4  ;;  %v806_v52 = vpop.f32.mrb[6].mxu1 }
 0x20a   :  { %v1049_v53 = vsel %vm1020_vm2, %v806_v52, -inf  ;;  %v2016_v54 = vpop.f32.mrb[7].mxu1 }
 0x20b   :  { %v1026_v55 = vrot.slane %v1025_v48, 1  ;;  %v1032_v56 = vmax.f32 %v1030_v43, %v1031_v49  ;;  %v1038_v57 = vrot.slane %v1037_v50, 2  ;;  %v1044_v58 = vmax.f32 %v1042_v46, %v1043_v51  ;;  %v876_v59 = vpop.f32.mrb[8].mxu0 }
 0x20c   :  { %v1050_v60 = vrot.slane %v1049_v53, 4  ;;  %v1056_v61 = vsel %vm1020_vm2, %v876_v59, -inf  ;;  %v2021_v62 = vpop.f32.mrb[9].mxu0 }
 0x20d   :  { %v1027_v63 = vmax.f32 %v1025_v48, %v1026_v55  ;;  %v1033_v1 = vrot.slane %v1032_v56, 1  ;;  %v1039_v2 = vmax.f32 %v1037_v50, %v1038_v57  ;;  %v1045_v3 = vrot.slane %v1044_v58, 2  ;;  %v946_v4 = vpop.f32.mrb[8].mxu1 }
 0x20e   :  { %v1051_v6 = vmax.f32 %v1049_v53, %v1050_v60  ;;  %v1057_v7 = vrot.slane %v1056_v61, 4  ;;  %v1063_v8 = vsel %vm1020_vm2, %v946_v4, -inf  ;;  %v2026_v9 = vpop.f32.mrb[9].mxu1 }
 0x20f   :  { %v1077_v10 = vsub.f32 %v526_v29, %v1027_v63  ;;  %v1034_v11 = vmax.f32 %v1032_v56, %v1033_v1  ;;  %v1040_v12 = vrot.slane %v1039_v2, 1  ;;  %v1046_v14 = vmax.f32 %v1044_v58, %v1045_v3  ;;  %v1016_v16 = vpop.f32.mrb[10].mxu0 }
 0x210   :  { %v1052_v17 = vrot.slane %v1051_v6, 2  ;;  %v1058_v18 = vmax.f32 %v1056_v61, %v1057_v7  ;;  %v1064_v20 = vrot.slane %v1063_v8, 4  ;;  %v1070_v15 = vsel %vm1020_vm2, %v1016_v16, -inf  ;;  %v2031_v27 = vpop.f32.mrb[11].mxu0 }
 0x211   :  { %v1085_v28 = vmul.f32 1.442695, %v1077_v10  ;;  %v1078_v30 = vsub.f32 %v596_v33, %v1034_v11  ;;  %v1041_v31 = vmax.f32 %v1039_v2, %v1040_v12  ;;  %v1047_v32 = vrot.slane %v1046_v14, 1 }
 0x212   :  { %v1053_v34 = vmax.f32 %v1051_v6, %v1052_v17  ;;  %v1059_v35 = vrot.slane %v1058_v18, 2  ;;  %v1065_v36 = vmax.f32 %v1063_v8, %v1064_v20  ;;  %v1071_v37 = vrot.slane %v1070_v15, 4 }
 0x213   :  { %2147 = vpow2.f32 %v1085_v28  ;;  %v1087_v29 = vmul.f32 1.442695, %v1078_v30  ;;  %v1079_v39 = vsub.f32 %v666_v38, %v1041_v31  ;;  %v1048_v41 = vmax.f32 %v1046_v14, %v1047_v32 }
 0x214   :  { %v1054_v42 = vrot.slane %v1053_v34, 1  ;;  %v1060_v43 = vmax.f32 %v1058_v18, %v1059_v35  ;;  %v1066_v44 = vrot.slane %v1065_v36, 2  ;;  %v1072_v46 = vmax.f32 %v1070_v15, %v1071_v37 }
 0x215   :  { %2149 = vpow2.f32 %v1087_v29  ;;  %v1089_v47 = vmul.f32 1.442695, %v1079_v39  ;;  %v1080_v48 = vsub.f32 %v736_v45, %v1048_v41 }
 0x216   :  { %v1055_v49 = vmax.f32 %v1053_v34, %v1054_v42  ;;  %v1061_v50 = vrot.slane %v1060_v43, 1  ;;  %v1067_v33 = vmax.f32 %v1065_v36, %v1066_v44  ;;  %v1073_v51 = vrot.slane %v1072_v46, 2 }
 0x217   :  { %2151 = vpow2.f32 %v1089_v47  ;;  %v1091_v53 = vmul.f32 1.442695, %v1080_v48 }
 0x218   :  { %v1081_v54 = vsub.f32 %v806_v52, %v1055_v49  ;;  %v1062_v55 = vmax.f32 %v1060_v43, %v1061_v50  ;;  %v1068_v56 = vrot.slane %v1067_v33, 1  ;;  %v1074_v57 = vmax.f32 %v1072_v46, %v1073_v51 }
 0x219   :  { %2153 = vpow2.f32 %v1091_v53 }
 0x21a   :  { %v1093_v38 = vmul.f32 1.442695, %v1081_v54  ;;  %v1082_v58 = vsub.f32 %v876_v59, %v1062_v55  ;;  %v1069_v60 = vmax.f32 %v1067_v33, %v1068_v56  ;;  %v1075_v61 = vrot.slane %v1074_v57, 1 }
 0x21c   :  { %2155 = vpow2.f32 %v1093_v38  ;;  %v1095_v62 = vmul.f32 1.442695, %v1082_v58  ;;  %v1083_v63 = vsub.f32 %v946_v4, %v1069_v60  ;;  %v1076_v1 = vmax.f32 %v1074_v57, %v1075_v61 }
 0x21d   :  { %v2429_v45 = vpop.eup %2147 }
 0x21e   :  { %v1101_v2 = vsel %vm1020_vm2, %v2429_v45, 0.0  ;;  %2157 = vpow2.f32 %v1095_v62  ;;  %v1097_v3 = vmul.f32 1.442695, %v1083_v63  ;;  %v1084_v52 = vsub.f32 %v1016_v16, %v1076_v1 }
 0x21f   :  { %v2433_v6 = vpop.eup %2149  ;;  %v1102_v7 = vrot.slane %v1101_v2, 4 }
 0x220   :  { %v1108_v59 = vsel %vm1020_vm2, %v2433_v6, 0.0  ;;  %2159 = vpow2.f32 %v1097_v3  ;;  %v1099_v8 = vmul.f32 1.442695, %v1084_v52 }
 0x221   :  { %v2437_v9 = vpop.eup %2151  ;;  %v1103_v4 = vadd.f32 %v1102_v7, %v1101_v2  ;;  %v1109_v10 = vrot.slane %v1108_v59, 4 }
 0x222   :  { %v1115_v11 = vsel %vm1020_vm2, %v2437_v9, 0.0  ;;  %2161 = vpow2.f32 %v1099_v8 }
 0x223   :  { %v2441_v12 = vpop.eup %2153  ;;  %v1104_v14 = vrot.slane %v1103_v4, 2  ;;  %v1110_v16 = vadd.f32 %v1109_v10, %v1108_v59  ;;  %v1116_v17 = vrot.slane %v1115_v11, 4 }
 0x224   :  { %v1122_v18 = vsel %vm1020_vm2, %v2441_v12, 0.0 }
 0x225   :  { %v1105_v20 = vadd.f32 %v1104_v14, %v1103_v4  ;;  %v1111_v15 = vrot.slane %v1110_v16, 2  ;;  %v1117_v27 = vadd.f32 %v1116_v17, %v1115_v11  ;;  %v1123_v28 = vrot.slane %v1122_v18, 4 }
 0x226   :  { %v2445_v30 = vpop.eup %2155  ;;  %v439_v14 = vrot.slane %v425_v23, %v2342_v40 }
 0x227   :  { %v1106_v31 = vrot.slane %v1105_v20, 1  ;;  %v1112_v32 = vadd.f32 %v1111_v15, %v1110_v16  ;;  %v1118_v34 = vrot.slane %v1117_v27, 2  ;;  %v1124_v35 = vadd.f32 %v1123_v28, %v1122_v18 }
 0x228   :  { %v2447_v36 = vpop.eup %2157  ;;  %v1129_v37 = vsel %vm1020_vm2, %v2445_v30, 0.0  ;;  %v457_v21 = vcombine.high %v439_v14, %v2257_v0 }
 0x229   :  { %v1107_v29 = vadd.f32 %v1106_v31, %v1105_v20  ;;  %v1113_v39 = vrot.slane %v1112_v32, 1  ;;  %v1119_v41 = vadd.f32 %v1118_v34, %v1117_v27  ;;  %v1125_v42 = vrot.slane %v1124_v35, 2 }
 0x22a   :  { %v2451_v43 = vpop.eup %2159  ;;  %v1130_v44 = vrot.slane %v1129_v37, 4  ;;  %v1136_v46 = vsel %vm1020_vm2, %v2447_v36, 0.0  ;;  %v458_v34 = vcombine.high %v448_v19, %v2257_v0 }
 0x22b   :  { %2163 = vrcp.f32 %v1107_v29  ;;  %v1114_v47 = vadd.f32 %v1113_v39, %v1112_v32  ;;  %v1120_v48 = vrot.slane %v1119_v41, 1  ;;  %v1126_v49 = vadd.f32 %v1125_v42, %v1124_v35 }
 0x22c   :  { %v2455_v50 = vpop.eup %2161  ;;  %v1131_v33 = vadd.f32 %v1130_v44, %v1129_v37  ;;  %v1137_v51 = vrot.slane %v1136_v46, 4  ;;  %v1143_v53 = vsel %vm1020_vm2, %v2451_v43, 0.0 }
 0x22d   :  { %2165 = vrcp.f32 %v1114_v47  ;;  %v1121_v54 = vadd.f32 %v1120_v48, %v1119_v41  ;;  %v1127_v55 = vrot.slane %v1126_v49, 1  ;;  %v1144_v56 = vrot.slane %v1143_v53, 4 }
 0x22e   :  { %v1132_v57 = vrot.slane %v1131_v33, 2  ;;  %v1138_v38 = vadd.f32 %v1137_v51, %v1136_v46  ;;  %v1150_v58 = vsel %vm1020_vm2, %v2455_v50, 0.0 }
 0x22f   :  { %2167 = vrcp.f32 %v1121_v54  ;;  %v1128_v60 = vadd.f32 %v1127_v55, %v1126_v49  ;;  %v1145_v61 = vadd.f32 %v1144_v56, %v1143_v53  ;;  %v1151_v62 = vrot.slane %v1150_v58, 4 }
 0x230   :  { %v1133_v63 = vadd.f32 %v1132_v57, %v1131_v33  ;;  %v1139_v1 = vrot.slane %v1138_v38, 2 }
 0x231   :  { %2169 = vrcp.f32 %v1128_v60  ;;  %v1146_v2 = vrot.slane %v1145_v61, 2  ;;  %v1152_v3 = vadd.f32 %v1151_v62, %v1150_v58 }
 0x232   :  { %v1134_v52 = vrot.slane %v1133_v63, 1  ;;  %v1140_v7 = vadd.f32 %v1139_v1, %v1138_v38 }
 0x233   :  { %v1147_v59 = vadd.f32 %v1146_v2, %v1145_v61  ;;  %v1153_v8 = vrot.slane %v1152_v3, 2 }
 0x234   :  { %v1135_v4 = vadd.f32 %v1134_v52, %v1133_v63  ;;  %v1141_v10 = vrot.slane %v1140_v7, 1 }
 0x235   :  { %v2164_v11 = vpop.eup %2163  ;;  %v1148_v16 = vrot.slane %v1147_v59, 1  ;;  %v1154_v17 = vadd.f32 %v1153_v8, %v1152_v3 }
 0x236   :  { %2171 = vrcp.f32 %v1135_v4  ;;  %v1142_v18 = vadd.f32 %v1141_v10, %v1140_v7  ;;  %v1165_v20 = vmul.f32 %v2164_v11, %v2429_v45 }
 0x237   :  { %v2166_v15 = vpop.eup %2165  ;;  %v1149_v27 = vadd.f32 %v1148_v16, %v1147_v59  ;;  %v1155_v28 = vrot.slane %v1154_v17, 1 }
 0x238   :  { %2173 = vrcp.f32 %v1142_v18  ;;  %2035 = vmatmul.mubr.msk.f32.vlgmr.msra.gmra.mrb[10].mxu1 %vm1173_vm3, %v1165_v20  ;;  %v1166_v31 = vmul.f32 %v2166_v15, %v2433_v6 }
 0x239   :  { %v2168_v32 = vpop.eup %2167  ;;  %2175 = vrcp.f32 %v1149_v27  ;;  %v1156_v23 = vadd.f32 %v1155_v28, %v1154_v17  ;;  %2043 = vmatpush3.msk.msra.mxu1 %vm1177_vm1, %v439_v14  ;;  %2044 = vmatprep.mubr.msk.f32.mxu1 %vm2258_vm0, %v2257_v0 }
 0x23a   :  { %2040 = vmatmul.mubr.msk.f32.vlgmr.msra.gmra.mrb[12].mxu0 %vm1173_vm3, %v1166_v31  ;;  %2052 = vmatprep.subr.mxu1 %v2257_v0  ;;  %v1167_v45 = vmul.f32 %v2168_v32, %v2437_v9 }
 0x23b   :  { %v2170_v6 = vpop.eup %2169  ;;  %2177 = vrcp.f32 %v1156_v23  ;;  %2048 = vmatpush3.msk.msra.mxu0 %vm1177_vm1, %v457_v21  ;;  %2049 = vmatprep.mubr.msk.f32.mxu0 %vm2258_vm0, %v2257_v0 }
 0x23c   :  { %2045 = vmatmul.mubr.msk.f32.vlgmr.msra.gmra.mrb[12].mxu1 %vm1173_vm3, %v1167_v45  ;;  %2057 = vmatprep.subr.mxu0 %v2257_v0  ;;  %v1168_v24 = vmul.f32 %v2170_v6, %v2441_v12  ;;  %v455_v12 = vrot.slane %v441_v25, %v2342_v40 }
 0x23d   :  { %2053 = vmatpush3.msk.msra.mxu1 %vm1177_vm1, %v448_v19  ;;  %2054 = vmatprep.mubr.msk.f32.mxu1 %vm2258_vm0, %v2257_v0 }
 0x23e   :  { %2050 = vmatmul.mubr.msk.f32.vlgmr.msra.gmra.mrb[14].mxu0 %vm1173_vm3, %v1168_v24  ;;  %2062 = vmatprep.subr.mxu1 %v2257_v0  ;;  %v459_v41 = vcombine.high %v455_v12, %v2257_v0 }
 0x23f   :  { %2058 = vmatpush3.msk.msra.mxu0 %vm1177_vm1, %v458_v34  ;;  %2059 = vmatprep.mubr.msk.f32.mxu0 %vm2258_vm0, %v2257_v0 }
 0x240   :  { %v2172_v9 = vpop.eup %2171  ;;  %2067 = vmatprep.subr.mxu0 %v2257_v0 }
 0x241   :  { %v1169_v35 = vmul.f32 %v2172_v9, %v2445_v30 }
 0x242   :  { %v2174_v37 = vpop.eup %2173 }
 0x243   :  { %v2176_v29 = vpop.eup %2175  ;;  %2055 = vmatmul.mubr.msk.f32.vlgmr.msra.gmra.mrb[14].mxu1 %vm1173_vm3, %v1169_v35  ;;  %v1170_v39 = vmul.f32 %v2174_v37, %v2447_v36 }
 0x244   :  { %2063 = vmatpush3.msk.msra.mxu1 %vm1177_vm1, %v455_v12  ;;  %2064 = vmatprep.mubr.msk.f32.mxu1 %vm2258_vm0, %v2257_v0  ;;  %v1171_v22 = vmul.f32 %v2176_v29, %v2451_v43 }
 0x245   :  { %v2178_v40 = vpop.eup %2177  ;;  %2060 = vmatmul.mubr.msk.f32.vlgmr.msra.gmra.mrb[16].mxu0 %vm1173_vm3, %v1170_v39 }
 0x246   :  { %2068 = vmatpush3.msk.msra.mxu0 %vm1177_vm1, %v459_v41  ;;  %2069 = vmatprep.mubr.msk.f32.mxu0 %vm2258_vm0, %v2257_v0  ;;  %v1172_v13 = vmul.f32 %v2178_v40, %v2455_v50 }
 0x247   :  { %2065 = vmatmul.mubr.msk.f32.vlgmr.msra.gmra.mrb[16].mxu1 %vm1173_vm3, %v1171_v22 }
 0x249   :  { %2070 = vmatmul.mubr.msk.f32.vlgmr.msra.gmra.mrb[18].mxu0 %vm1173_vm3, %v1172_v13 }
 0x30b   :  { %v1247_v25 = vpop.f32.mrb[10].mxu1 }
 0x30c   :  { %v1786_v30 = vsel %vm1177_vm1, %v1247_v25, 0.0  ;;  %v2036_v36 = vpop.f32.mrb[11].mxu1 }
 0x30d   :  { %v1787_v42 = vrot.slane %v1786_v30, 4  ;;  %v1323_v43 = vpop.f32.mrb[12].mxu0 }
 0x30e   :  { %v1793_v44 = vsel %vm1177_vm1, %v1323_v43, 0.0  ;;  %v2041_v46 = vpop.f32.mrb[13].mxu0 }
 0x30f   :  { %v1788_v47 = vadd.f32 %v1787_v42, %v1786_v30  ;;  %v1794_v48 = vrot.slane %v1793_v44, 4  ;;  %v1399_v49 = vpop.f32.mrb[12].mxu1 }
 0x310   :  { %v1800_v0 = vsel %vm1177_vm1, %v1399_v49, 0.0  ;;  %v2046_v33 = vpop.f32.mrb[13].mxu1 }
 0x311   :  { %v1789_v50 = vrot.slane %v1788_v47, 2  ;;  %v1795_v51 = vadd.f32 %v1794_v48, %v1793_v44  ;;  %v1801_v53 = vrot.slane %v1800_v0, 4  ;;  %v1475_v54 = vpop.f32.mrb[14].mxu0 }
 0x312   :  { %v1807_v55 = vsel %vm1177_vm1, %v1475_v54, 0.0  ;;  %v2051_v56 = vpop.f32.mrb[15].mxu0 }
 0x313   :  { %v1790_v57 = vadd.f32 %v1789_v50, %v1788_v47  ;;  %v1796_v38 = vrot.slane %v1795_v51, 2  ;;  %v1802_v58 = vadd.f32 %v1801_v53, %v1800_v0  ;;  %v1808_v60 = vrot.slane %v1807_v55, 4 }
 0x315   :  { %v1791_v61 = vrot.slane %v1790_v57, 1  ;;  %v1797_v62 = vadd.f32 %v1796_v38, %v1795_v51  ;;  %v1803_v63 = vrot.slane %v1802_v58, 2  ;;  %v1809_v1 = vadd.f32 %v1808_v60, %v1807_v55 }
 0x316   :  { %v1551_v2 = vpop.f32.mrb[14].mxu1  ;;  %v1783_v51 = vadd.f32 %v2313_v5, %v2307_v26 }
 0x317   :  { %v1792_v3 = vadd.f32 %v1791_v61, %v1790_v57  ;;  %v1798_v52 = vrot.slane %v1797_v62, 1  ;;  %v1804_v7 = vadd.f32 %v1803_v63, %v1802_v58  ;;  %v1810_v59 = vrot.slane %v1809_v1, 2  ;;  %v2056_v8 = vpop.f32.mrb[15].mxu1 }
 0x318   :  { %v1814_v4 = vsel %vm1177_vm1, %v1551_v2, 0.0  ;;  %v1627_v10 = vpop.f32.mrb[16].mxu0  ;;  %v1785_v61 = vmul.f32 0.5, %v1783_v51 }
 0x319   :  { %v1799_v11 = vadd.f32 %v1798_v52, %v1797_v62  ;;  %v1805_v14 = vrot.slane %v1804_v7, 1  ;;  %v1811_v16 = vadd.f32 %v1810_v59, %v1809_v1  ;;  %v2061_v17 = vpop.f32.mrb[17].mxu0  ;;  %v1842_v18 = vmul.f32 0.5, %v1792_v3 }
 0x31a   :  { %v1815_v20 = vrot.slane %v1814_v4, 4  ;;  %v1821_v15 = vsel %vm1177_vm1, %v1627_v10, 0.0  ;;  %v1703_v27 = vpop.f32.mrb[16].mxu1 }
 0x31b   :  { %v1843_v28 = vmul.f32 0.5, %v1799_v11  ;;  %v1806_v31 = vadd.f32 %v1805_v14, %v1804_v7  ;;  %v1812_v32 = vrot.slane %v1811_v16, 1  ;;  %v1822_v19 = vrot.slane %v1821_v15, 4  ;;  %v2066_v21 = vpop.f32.mrb[17].mxu1 }
 0x31c   :  { %v1816_v23 = vadd.f32 %v1815_v20, %v1814_v4  ;;  %v1828_v45 = vsel %vm1177_vm1, %v1703_v27, 0.0  ;;  %v1779_v6 = vpop.f32.mrb[18].mxu0 }
 0x31d   :  { %v1859_v24 = vsel %vm1858_vm4, %v1843_v28, %v1842_v18  ;;  %v1844_v34 = vmul.f32 0.5, %v1806_v31  ;;  %v1813_v9 = vadd.f32 %v1812_v32, %v1811_v16  ;;  %v1823_v12 = vadd.f32 %v1822_v19, %v1821_v15  ;;  %v2071_v35 = vpop.f32.mrb[19].mxu0 }
 0x31e   :  { %v1817_v37 = vrot.slane %v1816_v23, 2  ;;  %v1829_v29 = vrot.slane %v1828_v45, 4  ;;  %v1835_v39 = vsel %vm1177_vm1, %v1779_v6, 0.0 }
 0x31f   :  { %v1861_v41 = vsel %vm1860_vm5, %v1844_v34, %v1859_v24  ;;  %v1845_v22 = vmul.f32 0.5, %v1813_v9  ;;  %v1824_v40 = vrot.slane %v1823_v12, 2  ;;  %v1836_v13 = vrot.slane %v1835_v39, 4 }
 0x320   :  { %v1818_v25 = vadd.f32 %v1817_v37, %v1816_v23  ;;  %v1830_v30 = vadd.f32 %v1829_v29, %v1828_v45 }
 0x321   :  { %v1863_v36 = vsel %vm1862_vm6, %v1845_v22, %v1861_v41  ;;  %v1825_v42 = vadd.f32 %v1824_v40, %v1823_v12  ;;  %v1837_v43 = vadd.f32 %v1836_v13, %v1835_v39 }
 0x322   :  { %v1819_v44 = vrot.slane %v1818_v25, 1  ;;  %v1831_v46 = vrot.slane %v1830_v30, 2 }
 0x323   :  { %v1826_v47 = vrot.slane %v1825_v42, 1  ;;  %v1838_v48 = vrot.slane %v1837_v43, 2 }
 0x324   :  { %v1820_v49 = vadd.f32 %v1819_v44, %v1818_v25  ;;  %v1832_v0 = vadd.f32 %v1831_v46, %v1830_v30 }
 0x325   :  { %v1827_v33 = vadd.f32 %v1826_v47, %v1825_v42  ;;  %v1839_v50 = vadd.f32 %v1838_v48, %v1837_v43 }
 0x326   :  { %v1846_v53 = vmul.f32 0.5, %v1820_v49  ;;  %v1833_v54 = vrot.slane %v1832_v0, 1 }
 0x327   :  { %v1847_v55 = vmul.f32 0.5, %v1827_v33  ;;  %v1840_v56 = vrot.slane %v1839_v50, 1 }
 0x328   :  { %v1865_v57 = vsel %vm1864_vm7, %v1846_v53, %v1863_v36  ;;  %v1834_v38 = vadd.f32 %v1833_v54, %v1832_v0 }
 0x329   :  { %v1841_v58 = vadd.f32 %v1840_v56, %v1839_v50  ;;  %v1867_v60 = vsel %vm1866_vm8, %v1847_v55, %v1865_v57 }
 0x32a   :  { %v1848_v62 = vmul.f32 0.5, %v1834_v38 }
 0x32b   :  { %v1849_v63 = vmul.f32 0.5, %v1841_v58 }
 0x32c   :  { %v1869_v1 = vsel %vm1868_vm9, %v1848_v62, %v1867_v60 }
 0x32d   :  { %v1871_v2 = vsel %vm1870_vm10, %v1849_v63, %v1869_v1 }
 0x32e   :  { %v1873_v3 = vadd.f32 %v1871_v2, %v1785_v61 }
 0x330   :  { %1874 = vst [vmem:[#allocation7] sm:$0xff] %v1873_v3 }
 0x331   :  { %2234 = shalt.err (!%p2231_p6)
}
 0x332   :  { %s2235_s17 = scalar_lea.hbm %s2539_s3, 128 }
 0x333   :  { %p2236_p7 = scmp.ne.s32.totalorder %s2539_s3, %s2235_s17  ;;  %p2239_p8 = scmp.lt.u32.totalorder %s2235_s17, %s2539_s3 }
 0x335   :  { %p2241_p9 = pnand %p2239_p8, %p2236_p7 }
 0x337   :  { %2244 = shalt.err (!%p2241_p9)
}
 0x338   :  { %1884 = dma.vmem_to_hbm [thread:$0]  %s1882_s13, 128, %s2539_s3, [#allocation4]  }
 0x339   :  { %2249 = dma.done.wait [#allocation4], 128  }
 0x33a   :  { %2250 = vsyncadd [#allocation4], 4294967168 }
 0x33b   :  { %1888 = vsyncpa [#allocation3], 1 }
 0x33c   :  { %1889 = vsyncpa [#allocation6], 1 }
 0x33d   :  { %1890 = vsyncpa [#allocation4], 1 }

</bundles_post_ra>
